<compile_context>
chip_gen: v7x
topology: tpu7x:2x2x1
jax: 0.10.0
libtpu: 0.0.40
codegen_flags: <defaults>
</compile_context>

<pallas_src>
import jax
import jax.numpy as jnp
from jax.experimental import pallas as pl
from jax.experimental.pallas import tpu as pltpu


# ----------------------------------------------------------------------------
# Kernels
# ----------------------------------------------------------------------------
def _make_skff_kernel(height):
    """Build the SKFF kernel for a fixed number of branches."""
    if height == 2:
        # Exact 2-way-softmax identity: attn0 = sigmoid(a0 - a1), attn1 = 1-attn0.
        def kernel(x0_ref, x1_ref, w1_ref, wg_ref, alpha_ref, o_ref):
            # x*_ref: (1, C, Lt)   branch activations
            # w1_ref: (d, C)       conv_du 1x1 weight
            # wg_ref: (C, d)       wfc[0] - wfc[1]
            # alpha_ref: (1,) SMEM PReLU slope
            # o_ref : (1, C, Lt)
            alpha = alpha_ref[0]
            x0 = x0_ref[0]                                           # (C, Lt)
            x1 = x1_ref[0]
            u = x0 + x1                                              # feats_U
            z = jnp.dot(w1_ref[...], u,
                        preferred_element_type=jnp.float32)          # (d, Lt)
            z = jnp.where(z >= 0, z, alpha * z)                      # PReLU
            t = jnp.dot(wg_ref[...], z,
                        preferred_element_type=jnp.float32)          # a0 - a1
            g = 1.0 / (1.0 + jnp.exp(-t))                            # attn0
            v = x1 + (x0 - x1) * g                                   # feats_V
            o_ref[0] = v.astype(o_ref.dtype)
        return kernel

    # General height: single fused fc matmul + stabilized softmax over branches.
    def kernel(*refs):
        xs = refs[:height]
        w1_ref, wfc_ref, alpha_ref, o_ref = refs[height:height + 4]
        alpha = alpha_ref[0]
        branches = [x[0] for x in xs]                                # (C, Lt)
        u = branches[0]
        for i in range(1, height):
            u = u + branches[i]
        z = jnp.dot(w1_ref[...], u,
                    preferred_element_type=jnp.float32)              # (d, Lt)
        z = jnp.where(z >= 0, z, alpha * z)                          # PReLU
        # One MXU pass for all branch fcs: (height*C, d) @ (d, Lt)
        a_all = jnp.dot(wfc_ref[...], z,
                        preferred_element_type=jnp.float32)          # (h*C, Lt)
        C = branches[0].shape[0]
        a = [a_all[i * C:(i + 1) * C] for i in range(height)]        # aligned
        m = a[0]
        for i in range(1, height):
            m = jnp.maximum(m, a[i])
        e = [jnp.exp(ai - m) for ai in a]
        s = e[0]
        for i in range(1, height):
            s = s + e[i]
        inv_s = 1.0 / s                      # one divide, reused `height` times
        v = branches[0] * (e[0] * inv_s)
        for i in range(1, height):
            v = v + branches[i] * (e[i] * inv_s)
        o_ref[0] = v.astype(o_ref.dtype)
    return kernel


# ----------------------------------------------------------------------------
# VMEM-aware lane-tile selection
# ----------------------------------------------------------------------------
def _choose_l_tile(L, height, C, n_batch, dtype_bytes=4,
                   block_budget_bytes=20 << 20):
    """Largest lane tile (multiple of 128 dividing L, or L itself) whose
    double-buffered blocks fit the budget; keeps >=2 total parallel grid
    steps when batch==1 so both v7x TensorCores get work."""
    if L % 128 != 0:
        # Full-extent block (allowed by the full-dim exception). Small shapes.
        return L
    # Double-buffered input branches + double-buffered output, per lane.
    per_lane_bytes = 2 * (height + 1) * C * dtype_bytes
    max_lanes = max(128, block_budget_bytes // per_lane_bytes)
    cands = [t for t in range(128, L + 1, 128) if L % t == 0 and t <= max_lanes]
    if not cands:
        cands = [128]
    tile = cands[-1]
    if n_batch == 1 and tile == L:
        smaller = [t for t in cands if t < L]
        if smaller:
            tile = smaller[-1]
    return tile


# ----------------------------------------------------------------------------
# Wrapper
# ----------------------------------------------------------------------------
def skff_pallas(inp_feats, w1, wfc, alpha, l_tile=None):
    """SKFF forward.

    inp_feats: list/tuple of `height` arrays, each (N, C, H, W), or a
               pre-stacked (N, height, C, H, W) array.
    w1:        (d, C)          conv_du 1x1 weight (bias=False)
    wfc:       (height, C, d)  stacked fc 1x1 weights (bias=False)
    alpha:     (1,) f32        PReLU slope
    """
    if not isinstance(inp_feats, (list, tuple)):
        # Unstack lazily; the primary (fast) path is the unstacked list.
        inp_feats = [inp_feats[:, i] for i in range(inp_feats.shape[1])]
    height = len(inp_feats)
    N, C, H, W = inp_feats[0].shape
    d = w1.shape[0]
    L = H * W

    # Contiguous (free) reshape to a lane-dense layout: last dim = H*W.
    xs = [f.reshape(N, C, L) for f in inp_feats]

    if l_tile is None:
        l_tile = _choose_l_tile(L, height, C, N)
    assert L % l_tile == 0, "l_tile must divide H*W"
    grid = (N, L // l_tile)

    branch_spec = pl.BlockSpec((1, C, l_tile), lambda b, l: (b, 0, l))

    def full2d(shape):
        return pl.BlockSpec(shape, lambda b, l: (0, 0))

    if height == 2:
        weights = [w1, wfc[0] - wfc[1]]                  # (d, C), (C, d)
    else:
        weights = [w1, wfc.reshape(height * C, d)]       # (d, C), (h*C, d)

    in_specs = ([branch_spec] * height
                + [full2d(w.shape) for w in weights]
                + [pl.BlockSpec(memory_space=pltpu.MemorySpace.SMEM)])

    out = pl.pallas_call(
        _make_skff_kernel(height),
        out_shape=jax.ShapeDtypeStruct((N, C, L), inp_feats[0].dtype),
        grid_spec=pltpu.PrefetchScalarGridSpec(
            num_scalar_prefetch=0,
            grid=grid,
            in_specs=in_specs,
            out_specs=pl.BlockSpec((1, C, l_tile), lambda b, l: (b, 0, l)),
        ),
        compiler_params=pltpu.CompilerParams(
            dimension_semantics=("parallel", "parallel"),
            vmem_limit_bytes=32 << 20),
    )(*xs, *weights, alpha)

    return out.reshape(N, C, H, W)


# ----------------------------------------------------------------------------
# Pure-JAX reference (mirrors the PyTorch forward exactly)
# ----------------------------------------------------------------------------
def skff_ref(feats, w1, wfc, alpha):
    x = jnp.stack(feats, axis=1)                          # (N, h, C, H, W)
    u = jnp.sum(x, axis=1)
    z = jnp.einsum('dc,nchw->ndhw', w1, u)
    z = jnp.where(z >= 0, z, alpha * z)                   # PReLU (scalar)
    a = jnp.einsum('icd,ndhw->nichw', wfc, z)
    a = jax.nn.softmax(a, axis=1)
    return jnp.sum(x * a, axis=1)


if __name__ == "__main__":
    # SKFF(in_channels=16, height=2, reduction=8) -> d = max(16 // 8, 6) = 6.
    N, C, H, W = 2, 16, 16, 16
    reduction = 8
    d = max(C // reduction, 6)
    alpha = jnp.full((1,), 0.25, dtype=jnp.float32)       # nn.PReLU() default

    # ---- height = 2 (module default): sigmoid fast path ----------------------
    height = 2
    ks = jax.random.split(jax.random.PRNGKey(0), height + 2)
    feats = [jax.random.normal(ks[i], (N, C, H, W), jnp.float32)
             for i in range(height)]
    w1 = jax.random.normal(ks[height], (d, C), jnp.float32) * (1.0 / C) ** 0.5
    wfc = jax.random.normal(ks[height + 1], (height, C, d), jnp.float32) * (1.0 / d) ** 0.5

    out = jax.block_until_ready(skff_pallas(feats, w1, wfc, alpha))
    ref = skff_ref(feats, w1, wfc, alpha[0])
    assert out.shape == (N, C, H, W)
    assert jnp.allclose(out, ref, atol=1e-4, rtol=1e-4), "mismatch (height=2)"

    # ---- height = 3: general fused-fc + softmax path --------------------------
    height = 3
    ks = jax.random.split(jax.random.PRNGKey(1), height + 2)
    feats3 = [jax.random.normal(ks[i], (N, C, H, W), jnp.float32)
              for i in range(height)]
    w1_3 = jax.random.normal(ks[height], (d, C), jnp.float32) * (1.0 / C) ** 0.5
    wfc3 = jax.random.normal(ks[height + 1], (height, C, d), jnp.float32) * (1.0 / d) ** 0.5

    out3 = jax.block_until_ready(skff_pallas(feats3, w1_3, wfc3, alpha))
    ref3 = skff_ref(feats3, w1_3, wfc3, alpha[0])
    assert out3.shape == (N, C, H, W)
    assert jnp.allclose(out3, ref3, atol=1e-4, rtol=1e-4), "mismatch (height=3)"

    print("KERNEL_OK")
</pallas_src>

<mosaic_0001>
module attributes {stable_mosaic.version = 11 : i64} {
  func.func @kernel(%arg0: i32, %arg1: i32, %arg2: memref<1x16x256xf32, #tpu.memory_space<vmem>>, %arg3: memref<1x16x256xf32, #tpu.memory_space<vmem>>, %arg4: memref<6x16xf32, #tpu.memory_space<vmem>>, %arg5: memref<16x6xf32, #tpu.memory_space<vmem>>, %arg6: memref<1xf32, #tpu.memory_space<smem>>, %arg7: memref<1x16x256xf32, #tpu.memory_space<vmem>>) attributes {dimension_semantics = [#tpu.dimension_semantics<parallel>, #tpu.dimension_semantics<parallel>], iteration_bounds = array<i64: 2, 1>, scalar_prefetch = 0 : i64, scratch_operands = 0 : i64, tpu.core_type = #tpu.core_type<tc>, window_params = [{transform_indices = @transform_0, window_bounds = array<i64: 1, 16, 256>}, {transform_indices = @transform_1, window_bounds = array<i64: 1, 16, 256>}, {pipeline_mode = #tpu.pipeline_mode<synchronous>, transform_indices = @transform_2, window_bounds = array<i64: 6, 16>}, {pipeline_mode = #tpu.pipeline_mode<synchronous>, transform_indices = @transform_3, window_bounds = array<i64: 16, 6>}, {transform_indices = @transform_4, window_bounds = array<i64: 1>}, {transform_indices = @transform_5, window_bounds = array<i64: 1, 16, 256>}]} {
    %c0 = arith.constant 0 : index
    %0 = memref.load %arg6[%c0] : memref<1xf32, #tpu.memory_space<smem>>
    %c0_0 = arith.constant 0 : index
    %c0_1 = arith.constant 0 : index
    %c0_2 = arith.constant 0 : index
    %1 = vector.load %arg2[%c0_0, %c0_1, %c0_2] : memref<1x16x256xf32, #tpu.memory_space<vmem>>, vector<1x16x256xf32>
    %2 = vector.shape_cast %1 : vector<1x16x256xf32> to vector<16x256xf32>
    %c0_3 = arith.constant 0 : index
    %c0_4 = arith.constant 0 : index
    %c0_5 = arith.constant 0 : index
    %3 = vector.load %arg3[%c0_3, %c0_4, %c0_5] : memref<1x16x256xf32, #tpu.memory_space<vmem>>, vector<1x16x256xf32>
    %4 = vector.shape_cast %3 : vector<1x16x256xf32> to vector<16x256xf32>
    %5 = arith.addf %2, %4 : vector<16x256xf32>
    %c0_6 = arith.constant 0 : index
    %c0_7 = arith.constant 0 : index
    %6 = vector.load %arg4[%c0_6, %c0_7] : memref<6x16xf32, #tpu.memory_space<vmem>>, vector<6x16xf32>
    %cst = arith.constant dense<0.000000e+00> : vector<6x256xf32>
    %7 = tpu.matmul %6, %5, %cst {dimension_numbers = #tpu.dot_dimension_numbers<[1], [0], [0], [1], [0, 0, 1, 1], [], []>} : vector<6x16xf32>, vector<16x256xf32>, vector<6x256xf32> -> vector<6x256xf32>
    %cst_8 = arith.constant 0.000000e+00 : f32
    %8 = vector.broadcast %cst_8 : f32 to vector<6x256xf32>
    %9 = arith.cmpf oge, %7, %8 : vector<6x256xf32>
    %10 = vector.broadcast %0 : f32 to vector<6x256xf32>
    %11 = arith.mulf %10, %7 : vector<6x256xf32>
    %12 = arith.select %9, %7, %11 : vector<6x256xi1>, vector<6x256xf32>
    %c0_9 = arith.constant 0 : index
    %c0_10 = arith.constant 0 : index
    %13 = vector.load %arg5[%c0_9, %c0_10] : memref<16x6xf32, #tpu.memory_space<vmem>>, vector<16x6xf32>
    %cst_11 = arith.constant dense<0.000000e+00> : vector<16x256xf32>
    %14 = tpu.matmul %13, %12, %cst_11 {dimension_numbers = #tpu.dot_dimension_numbers<[1], [0], [0], [1], [0, 0, 1, 1], [], []>} : vector<16x6xf32>, vector<6x256xf32>, vector<16x256xf32> -> vector<16x256xf32>
    %cst_12 = arith.constant 0.000000e+00 : f32
    %15 = vector.broadcast %cst_12 : f32 to vector<16x256xf32>
    %16 = arith.subf %15, %14 : vector<16x256xf32>
    %17 = math.exp %16 : vector<16x256xf32>
    %cst_13 = arith.constant 1.000000e+00 : f32
    %18 = vector.broadcast %cst_13 : f32 to vector<16x256xf32>
    %19 = arith.addf %18, %17 : vector<16x256xf32>
    %cst_14 = arith.constant 1.000000e+00 : f32
    %20 = vector.broadcast %cst_14 : f32 to vector<16x256xf32>
    %21 = arith.divf %20, %19 : vector<16x256xf32>
    %22 = arith.subf %2, %4 : vector<16x256xf32>
    %23 = arith.mulf %22, %21 : vector<16x256xf32>
    %24 = arith.addf %4, %23 : vector<16x256xf32>
    %c0_15 = arith.constant 0 : index
    %c0_16 = arith.constant 0 : index
    %c0_17 = arith.constant 0 : index
    %25 = vector.load %arg7[%c0_15, %c0_16, %c0_17] : memref<1x16x256xf32, #tpu.memory_space<vmem>>, vector<1x16x256xf32>
    %26 = vector.shape_cast %25 : vector<1x16x256xf32> to vector<16x256xf32>
    %27 = vector.shape_cast %24 : vector<16x256xf32> to vector<1x16x256xf32>
    tpu.vector_store %arg7[%c0_15, %c0_16, %c0_17], %27 {strides = array<i32>} : memref<1x16x256xf32, #tpu.memory_space<vmem>>, vector<1x16x256xf32>,
    return
  }
  func.func @transform_0(%arg0: i32, %arg1: i32) -> (i32, i32, i32) {
    %c0_i32 = arith.constant 0 : i32
    %c0_i32_0 = arith.constant 0 : i32
    return %arg0, %c0_i32, %arg1 : i32, i32, i32
  }
  func.func @transform_1(%arg0: i32, %arg1: i32) -> (i32, i32, i32) {
    %c0_i32 = arith.constant 0 : i32
    %c0_i32_0 = arith.constant 0 : i32
    return %arg0, %c0_i32, %arg1 : i32, i32, i32
  }
  func.func @transform_2(%arg0: i32, %arg1: i32) -> (i32, i32) {
    %c0_i32 = arith.constant 0 : i32
    %c0_i32_0 = arith.constant 0 : i32
    %c0_i32_1 = arith.constant 0 : i32
    return %c0_i32, %c0_i32_0 : i32, i32
  }
  func.func @transform_3(%arg0: i32, %arg1: i32) -> (i32, i32) {
    %c0_i32 = arith.constant 0 : i32
    %c0_i32_0 = arith.constant 0 : i32
    %c0_i32_1 = arith.constant 0 : i32
    return %c0_i32, %c0_i32_0 : i32, i32
  }
  func.func @transform_4(%arg0: i32, %arg1: i32) -> i32 {
    %c0_i32 = arith.constant 0 : i32
    %c0_i32_0 = arith.constant 0 : i32
    return %c0_i32 : i32
  }
  func.func @transform_5(%arg0: i32, %arg1: i32) -> (i32, i32, i32) {
    %c0_i32 = arith.constant 0 : i32
    %c0_i32_0 = arith.constant 0 : i32
    return %arg0, %c0_i32, %arg1 : i32, i32, i32
  }
}

</mosaic_0001>

<bundles_post_ra>
// kernel: tpu_custom_call.1
= control target key start
LH: loop header
LB: loop body
LE: loop exit
PB: predicated region body
PF: predicated region fallthrough
CT: control target
= control target key end

     0   :  { %s1261_s0 = inlined_call_operand.hbm [shape: f32[2,16,256], index: 0, kind: input, shape index: {}]   ;;  %s1262_s1 = inlined_call_operand.hbm [shape: f32[2,16,256], index: 1, kind: input, shape index: {}]   ;;  %s1263_s2 = inlined_call_operand.vmem [shape: f32[6,16], index: 2, kind: input, shape index: {}]   ;;  %s1264_s3 = inlined_call_operand.vmem [shape: f32[16,6], index: 3, kind: input, shape index: {}]   ;;  %s1265_s4 = inlined_call_operand.<no memory space> [shape: f32[1], index: 4, kind: input, shape index: {}]   ;;  %s1266_s5 = inlined_call_operand.hbm [shape: f32[2,16,256], index: 5, kind: output, shape index: {}]  }
   0x1   :  { %10 = sst [smem:[#allocation2]] %s1265_s4 }
   0x2   :  { %11 = vsyncpa [#allocation4], 0 }
   0x3   :  { %13 = vsyncpa [#allocation4 + $0x1], 0 }
   0x4   :  { %14 = vsyncpa [#allocation7], 0 }
   0x5   :  { %16 = vsyncpa [#allocation7 + $0x1], 0 }
   0x6   :  { %17 = vsyncpa [#allocation5], 0 }
   0x7   :  { %19 = vsyncpa [#allocation5 + $0x1], 0  ;;  %s975_s20 = smov 0   ;;  %s977_s21 = smov 0  }
   0x8   :  { %s979_s22 = smov 0   ;;  %s981_s23 = smov 0  }
   0x9   :  { %s983_s24 = smov 0   ;;  %s985_s25 = smov 0  }
   0xa LB: > { %s667_s4 = sadd.s32 4294967295, %s932_s25   ;;  %s668_s26 = sadd.s32 4294967294, %s932_s25   ;;  %s932_s25 = sphi %s985_s25, %s25_s25   ;;  %s928_s24 = sphi %s983_s24, %s1286_s24   ;;  %s924_s23 = sphi %s981_s23, %s1285_s23   ;;  %s920_s22 = sphi %s979_s22, %s1284_s22   ;;  %s916_s21 = sphi %s977_s21, %s1283_s21   ;;  %s912_s20 = sphi %s975_s20, %s1282_s20  }
   0xb   : > { %s37_s27 = sadd.s32 1, %s928_s24  ;;  %s46_s28 = sadd.s32 1, %s920_s22 }
   0xc   : > { %p39_p0 = scmp.ge.s32.totalorder %s37_s27, 2  ;;  %p53_p1 = scmp.ne.s32.totalorder %s920_s22, %s916_s21 }
   0xd   : > { %p54_p2 = scmp.eq.s32.totalorder %s932_s25, 0  ;;  %p59_p3 = scmp.ne.s32.totalorder %s916_s21, %s912_s20 }
   0xe   : > { %s1288_s27 = smov (%p39_p0, %s37_s27), 0  ;;  %p60_p5 = scmp.eq.s32.totalorder %s667_s4, 0 }
   0xf   : > { %p1016_p4 = por %p54_p2, %p53_p1  ;;  %s41_s30 = ssub.s32 %s928_s24, %s1288_s27 }
  0x10   : > { %p176_p6 = scmp.eq.s32.totalorder %s667_s4, 1  ;;  %p44_p7 = scmp.eq.s32.totalorder %s41_s30, 0 }
  0x11   : > { %p1022_p8 = por %p60_p5, %p59_p3  ;;  %p182_p10 = scmp.eq.s32.totalorder %s668_s26, 1 }
  0x12   : > { %p1026_p9 = por %p176_p6, %p53_p1  ;;  %p715_p13 = scmp.lt.s32.totalorder %s932_s25, 2 }
  0x13   : > { %s1271_s6 = scalar_select %p1022_p8, 1, 0 }
  0x14   : > { %s1272_s7 = scalar_select %p1026_p9, 1, 0 }
  0x15   : > { %s1031_s8 = scalar_select %p44_p7, %s920_s22, %s46_s28  }
  0x16   : > { %p1033_p11 = por %p182_p10, %p59_p3  ;;  %s1040_s10 = sand.u32 1, %s920_s22  }
  0x17   : > { %s671_s11 = sshll.u32 %s1040_s10, 5  ;;  %s691_s12 = sshll.u32 %s928_s24, 9 }
  0x18   : > { %s1273_s9 = scalar_select %p1033_p11, 1, 0 }
  0x19   : > { %s1049_s15 = scalar_lea.hbm %s1261_s0, %s691_s12  ;;  %s215_s16 = scalar_lea.vmem [#allocation3], %s671_s11 }
  0x1a   : > { %s224_s17 = sshll.u32 %s215_s16, 4  ;;  %p1057_p0 = pnand %p715_p13, %p1016_p4  ;;  %s1053_s17 = int_to_ptr.vmem [resolvable:$true] %s224_s17 }
  0x1b   : > { %s212_s19 = scalar_lea.sflag [#allocation4], %s1040_s10  ;;  %s786_s4 = scalar_lea.hbm %s1049_s15, 512 }
  0x1c   : > { %p787_p2 = scmp.ne.s32.totalorder %s1049_s15, %s786_s4  ;;  %p788_p3 = pneg %p1057_p0 }
  0x1d   : > { %s791_s29 = scalar_lea.hbm %s1261_s0, 1024  ;;  %p792_p4 = scmp.lt.u32.totalorder %s1049_s15, %s1261_s0 }
  0x1e   : > { %p789_p5 = pnand %p788_p3, %p787_p2  ;;  %p793_p7 = scmp.lt.u32.totalorder %s791_s29, %s786_s4 }
  0x1f   : > { %p795_p13 = scmp.lt.u32.totalorder %s786_s4, %s1049_s15 }
  0x20   : > { %p790_p6 = pneg %p789_p5  ;;  %p794_p10 = por %p793_p7, %p792_p4 }
  0x22   : > { %p796_p12 = por %p795_p13, %p794_p10 }
  0x24   : > { %p797_p1 = pnand %p796_p12, %p790_p6 }
  0x26   : > { %800 = shalt.err (!%p797_p1)
}
  0x27   : > { %s801_s14 = scalar_lea.vmem %s1053_s17, 512  ;;  %s934_s16 = smov [#allocation3]  }
  0x28   : > { %p802_p2 = scmp.ne.s32.totalorder %s1053_s17, %s801_s14  ;;  %s806_s26 = sshll.u32 %s934_s16, 4  ;;  %s807_s26 = int_to_ptr.vmem [resolvable:$false] %s806_s26 }
  0x29   : > { %s808_s28 = scalar_lea.vmem %s807_s26, 1024  ;;  %p809_p9 = scmp.lt.s32.totalorder %s1053_s17, %s807_s26 }
  0x2a   : > { %p804_p5 = pnand %p802_p2, %p788_p3  ;;  %p810_p4 = scmp.lt.s32.totalorder %s808_s28, %s801_s14 }
  0x2c   : > { %p805_p11 = pneg %p804_p5  ;;  %p811_p7 = por %p810_p4, %p809_p9 }
  0x2e   : > { %p812_p10 = pnand %p811_p7, %p805_p11 }
  0x30   : > { %815 = shalt.err (!%p812_p10)
}
  0x31   : > { %s1268_s4 = smov 256   ;;  %s936_s29 = smov 16  }
  0x32   : > { %707 = dma.hbm_to_vmem [thread:$0]  (!%p1057_p0), %s1049_s15, 512, %s1053_s17, %s212_s19, %s1268_s4, %s1268_s4, %s936_s29  }
  0x33   : > { %p255_p9 = scmp.lt.s32.totalorder %s932_s25, 3  ;;  %s1099_s14 = scalar_lea.hbm %s1262_s1, %s691_s12 }
  0x34   : > { %p1275_p11 = scmp.ge.s32.totalorder %s932_s25, 1  ;;  %s238_s26 = scalar_lea.vmem [#allocation6], %s671_s11 }
  0x35   : > { %s247_s28 = sshll.u32 %s238_s26, 4  ;;  %s235_s15 = scalar_lea.sflag [#allocation7], %s1040_s10  ;;  %s1109_s28 = int_to_ptr.vmem [resolvable:$true] %s247_s28 }
  0x36   : > { %p1103_p12 = pnand %p1275_p11, %p255_p9  ;;  %s816_s17 = scalar_lea.hbm %s1099_s14, 512 }
  0x37   : > { %p817_p1 = scmp.ne.s32.totalorder %s1099_s14, %s816_s17  ;;  %s821_s30 = scalar_lea.hbm %s1262_s1, 1024 }
  0x38   : > { %p822_p2 = scmp.lt.u32.totalorder %s1099_s14, %s1262_s1  ;;  %p823_p5 = scmp.lt.u32.totalorder %s821_s30, %s816_s17 }
  0x39   : > { %p819_p6 = pnand %p817_p1, %p788_p3  ;;  %p825_p7 = scmp.lt.u32.totalorder %s816_s17, %s1099_s14 }
  0x3a   : > { %p824_p4 = por %p823_p5, %p822_p2 }
  0x3b   : > { %p820_p13 = pneg %p819_p6 }
  0x3c   : > { %p826_p10 = por %p825_p7, %p824_p4 }
  0x3e   : > { %p827_p9 = pnand %p826_p10, %p820_p13 }
  0x40   : > { %830 = shalt.err (!%p827_p9)
}
  0x41   : > { %s831_s11 = scalar_lea.vmem %s1109_s28, 512  ;;  %s937_s26 = smov [#allocation6]  }
  0x42   : > { %p832_p11 = scmp.ne.s32.totalorder %s1109_s28, %s831_s11  ;;  %s836_s12 = sshll.u32 %s937_s26, 4  ;;  %s837_s12 = int_to_ptr.vmem [resolvable:$false] %s836_s12 }
  0x43   : > { %s838_s4 = scalar_lea.vmem %s837_s12, 1024  ;;  %p839_p8 = scmp.lt.s32.totalorder %s1109_s28, %s837_s12 }
  0x44   : > { %p834_p1 = pnand %p832_p11, %p788_p3  ;;  %p840_p2 = scmp.lt.s32.totalorder %s838_s4, %s831_s11 }
  0x46   : > { %p835_p6 = pneg %p834_p1  ;;  %p841_p5 = por %p840_p2, %p839_p8 }
  0x48   : > { %p842_p4 = pnand %p841_p5, %p835_p6 }
  0x4a   : > { %845 = shalt.err (!%p842_p4)
}
  0x4b   : > { %s1277_s17 = smov 256   ;;  %259 = sbr.rel (%p1103_p12) target bundleno = 578 (0x242), region = 40 }
  0x4c   : > { %710 = dma.hbm_to_vmem [thread:$0]  (!%p1057_p0), %s1099_s14, 512, %s1109_s28, %s235_s15, %s1277_s17, %s1277_s17, %s936_s29  }
  0x4d   : > { %s1143_s19 = sand.u32 (!%p1103_p12), 1, %s916_s21   ;;  %p1278_p8 = scmp.ne.s32.totalorder (!%p1103_p12), %s1271_s6, 0 }
  0x4e   : > { %s1146_s30 = sshll.u32 (!%p1103_p12), %s1143_s19, 5  ;;  %s262_s18 = scalar_lea.sflag (!%p1103_p12), [#allocation4], %s1143_s19 }
  0x4f   : > { %s265_s13 = scalar_lea.vmem (!%p1103_p12), [#allocation3], %s1146_s30 }
  0x52   : > { %899 = dma.done.wait (%p1278_p8), %s262_s18, 512  }
  0x53   : > { %901 = vsyncadd (%p1278_p8), %s262_s18, 4294966784  ;;  %s271_s10 = scalar_lea.sflag [#allocation7], %s1143_s19  ;;  %s274_s29 = scalar_lea.vmem [#allocation6], %s1146_s30 }
  0x54   : > { %903 = dma.done.wait (%p1278_p8), %s271_s10, 512  }
  0x55   : > { %905 = vsyncadd (%p1278_p8), %s271_s10, 4294966784  ;;  %v938_v0 = vmov 0.0   ;;  %v1160_v1 = vld [vmem:[%s265_s13 + $0x8] sm:$0xff]  ;;  %v1162_v2 = vld [vmem:[%s265_s13 + $0x18] sm:$0xff]  ;;  %vm323_vm0 = vcmask 130048   ;;  %s309_s16 = sld [smem:[#allocation2]] }
  0x56   : > { %391 = vmatprep.mubr.f32.mxu0 %v938_v0  ;;  %485 = vmatprep.mubr.f32.mxu1 %v938_v0  ;;  %v1164_v3 = vld [vmem:[%s274_s29 + $0x8] sm:$0xff]  ;;  %v1166_v4 = vld [vmem:[%s274_s29 + $0x18] sm:$0xff]  ;;  %v1170_v6 = vld [vmem:[%s265_s13] sm:$0xff]  ;;  %vm414_vm3 = vcmask 1045504   ;;  %vm407_vm4 = vcmask 48128   ;;  %s693_s12 = sshll.u32 %s924_s23, 9 }
  0x57   : > { %v319_v5 = vadd.f32 %v1164_v3, %v1160_v1  ;;  %v1172_v7 = vld [vmem:[%s265_s13 + $0x10] sm:$0xff]  ;;  %v321_v8 = vadd.f32 %v1166_v4, %v1162_v2  ;;  %v1176_v9 = vld [vmem:[%s274_s29] sm:$0xff]  ;;  %v406_v24 = vld [vmem:[%s1264_s3 + $0x8] sm:$0xff]  ;;  %v523_v46 = vsub.f32 %v1160_v1, %v1164_v3  ;;  %v525_v51 = vsub.f32 %v1162_v2, %v1166_v4  ;;  %s305_s4 = scalar_lea.vmem [#allocation8], %s1146_s30  ;;  %s1209_s10 = scalar_lea.hbm %s1266_s5, %s693_s12 }
  0x58   : > { %v1178_v10 = vld [vmem:[%s274_s29 + $0x10] sm:$0xff]  ;;  %v318_v11 = vadd.f32 %v1176_v9, %v1170_v6  ;;  %v322_v15 = vld [vmem:[%s1263_s2] sm:$0x3f]  ;;  %v522_v45 = vsub.f32 %v1170_v6, %v1176_v9  ;;  %s554_s17 = sshll.u32 %s305_s4, 4  ;;  %s539_s23 = scalar_lea.sflag [#allocation5], %s1143_s19  ;;  %s1211_s17 = int_to_ptr.vmem [resolvable:$true] %s554_s17 }
  0x59   : > { %v320_v12 = vadd.f32 %v1178_v10, %v1172_v7  ;;  %v694_v13 = vpack.c.bf16 %v321_v8, %v319_v5  ;;  %v405_v22 = vld [vmem:[%s1264_s3] sm:$0xff]  ;;  %v524_v49 = vsub.f32 %v1172_v7, %v1178_v10  ;;  %s846_s30 = scalar_lea.vmem %s1211_s17, 512  ;;  %p1279_p3 = scmp.ne.s32.totalorder %s1272_s7, 0 }
  0x5a   : > { %p847_p0 = scmp.ne.s32.totalorder %s1211_s17, %s846_s30  ;;  %s939_s29 = smov [#allocation8]  }
  0x5b   : > { %v696_v14 = vpack.c.bf16 %v320_v12, %v318_v11  ;;  %695 = vmatprep.subr.bf16.mxu0 %v694_v13  ;;  %v400_v16 = vstv %s309_s16  ;;  %s850_s6 = sshll.u32 %s939_s29, 4  ;;  %s851_s6 = int_to_ptr.vmem [resolvable:$false] %s850_s6 }
  0x5c   : > { %p848_p12 = pnand %p847_p0, %p1279_p3  ;;  %s852_s14 = scalar_lea.vmem %s851_s6, 1024 }
  0x5d   : > { %697 = vmatpush1.bf16.msra.mxu0 %v696_v14  ;;  %p853_p7 = scmp.lt.s32.totalorder %s1211_s17, %s851_s6  ;;  %p854_p10 = scmp.lt.s32.totalorder %s852_s14, %s846_s30 }
  0x5e   : > { %p849_p13 = pneg %p848_p12 }
  0x5f   : > { %p855_p9 = por %p854_p10, %p853_p7 }
  0x60   : > { %681 = vmatmul.mubr.msk.f32.vlgmr.msra.gmra.mrb[0].mxu0 %vm323_vm0, %v322_v15 }
  0x61   : > { %p856_p11 = pnand %p855_p9, %p849_p13 }
 0x133   : > { %v393_v17 = vpop.f32.mrb[0].mxu0 }
 0x134   : > { %v395_v18 = vpop.f32.mrb[1].mxu0  ;;  %v401_v19 = vmul.f32 %v400_v16, %v393_v17  ;;  %vm398_vm1 = vcmp.ge.f32.partialorder %v393_v17, 0.0 }
 0x135   : > { %vm399_vm2 = vcmp.ge.f32.partialorder %v395_v18, 0.0  ;;  %v402_v20 = vmul.f32 %v400_v16, %v395_v18 }
 0x136   : > { %v403_v23 = vsel %vm398_vm1, %v393_v17, %v401_v19 }
 0x137   : > { %v404_v21 = vsel %vm399_vm2, %v395_v18, %v402_v20 }
 0x138   : > { %682 = vmatprep.subr.msk.mxu1 %vm414_vm3, %v404_v21 }
 0x139   : > { %683 = vmatpush1.msk.msra.mxu1 %vm414_vm3, %v403_v23 }
 0x13a   : > { %684 = vmatmul.mubr.msk.f32.vlgmr.msra.gmra.mrb[0].mxu1 %vm407_vm4, %v405_v22 }
 0x13b   : > { %491 = vmatprep.mubr.f32.mxu1 %v938_v0 }
 0x13e   : > { %685 = vmatmul.mubr.msk.f32.gmra.mrb[2].mxu1 %vm407_vm4, %v406_v24 }
 0x20d   : > { %v487_v25 = vpop.f32.mrb[0].mxu1 }
 0x20e   : > { %v498_v26 = vsub.f32 0.0, %v487_v25  ;;  %v489_v27 = vpop.f32.mrb[1].mxu1 }
 0x20f   : > { %v499_v28 = vsub.f32 0.0, %v489_v27 }
 0x210   : > { %v502_v29 = vmul.f32 1.442695, %v498_v26 }
 0x211   : > { %v504_v30 = vmul.f32 1.442695, %v499_v28  ;;  %v493_v31 = vpop.f32.mrb[2].mxu1 }
 0x212   : > { %770 = vpow2.f32 %v502_v29  ;;  %v500_v32 = vsub.f32 0.0, %v493_v31  ;;  %v495_v33 = vpop.f32.mrb[3].mxu1 }
 0x213   : > { %772 = vpow2.f32 %v504_v30  ;;  %v501_v34 = vsub.f32 0.0, %v495_v33 }
 0x214   : > { %v506_v35 = vmul.f32 1.442695, %v500_v32 }
 0x215   : > { %v508_v36 = vmul.f32 1.442695, %v501_v34 }
 0x216   : > { %774 = vpow2.f32 %v506_v35 }
 0x217   : > { %776 = vpow2.f32 %v508_v36 }
 0x21c   : > { %v771_v37 = vpop.eup %770 }
 0x21d   : > { %v773_v38 = vpop.eup %772  ;;  %v510_v39 = vadd.f32 1.0, %v771_v37 }
 0x21e   : > { %v511_v40 = vadd.f32 1.0, %v773_v38 }
 0x21f   : > { %778 = vrcp.f32 %v510_v39 }
 0x220   : > { %v775_v41 = vpop.eup %774  ;;  %780 = vrcp.f32 %v511_v40 }
 0x221   : > { %v777_v42 = vpop.eup %776  ;;  %v512_v43 = vadd.f32 1.0, %v775_v41 }
 0x222   : > { %v513_v44 = vadd.f32 1.0, %v777_v42 }
 0x223   : > { %782 = vrcp.f32 %v512_v43 }
 0x224   : > { %784 = vrcp.f32 %v513_v44 }
 0x229   : > { %v779_v47 = vpop.eup %778 }
 0x22a   : > { %v781_v48 = vpop.eup %780  ;;  %v526_v50 = vmul.f32 %v779_v47, %v522_v45 }
 0x22b   : > { %v527_v52 = vmul.f32 %v781_v48, %v523_v46 }
 0x22c   : > { %v530_v53 = vadd.f32 %v526_v50, %v1176_v9 }
 0x22d   : > { %v783_v54 = vpop.eup %782  ;;  %v531_v55 = vadd.f32 %v527_v52, %v1164_v3 }
 0x22e   : > { %v785_v56 = vpop.eup %784  ;;  %534 = vst [vmem:[%s305_s4] sm:$0xff] %v530_v53  ;;  %v528_v57 = vmul.f32 %v783_v54, %v524_v49 }
 0x22f   : > { %535 = vst [vmem:[%s305_s4 + $0x8] sm:$0xff] %v531_v55  ;;  %v529_v58 = vmul.f32 %v785_v56, %v525_v51 }
 0x230   : > { %v532_v59 = vadd.f32 %v528_v57, %v1178_v10 }
 0x231   : > { %v533_v60 = vadd.f32 %v529_v58, %v1166_v4 }
 0x232   : > { %536 = vst [vmem:[%s305_s4 + $0x10] sm:$0xff] %v532_v59 }
 0x233   : > { %537 = vst [vmem:[%s305_s4 + $0x18] sm:$0xff] %v533_v60 }
 0x234   : > { %859 = shalt.err (!%p856_p11)
}
 0x235   : > { %s860_s16 = scalar_lea.hbm %s1209_s10, 512  ;;  %s864_s11 = scalar_lea.hbm %s1266_s5, 1024 }
 0x236   : > { %p861_p1 = scmp.ne.s32.totalorder %s1209_s10, %s860_s16  ;;  %p865_p5 = scmp.lt.u32.totalorder %s1209_s10, %s1266_s5 }
 0x237   : > { %p866_p4 = scmp.lt.u32.totalorder %s864_s11, %s860_s16  ;;  %p868_p0 = scmp.lt.u32.totalorder %s860_s16, %s1209_s10 }
 0x238   : > { %p862_p6 = pnand %p861_p1, %p1279_p3 }
 0x239   : > { %p867_p8 = por %p866_p4, %p865_p5 }
 0x23a   : > { %p863_p2 = pneg %p862_p6 }
 0x23b   : > { %p869_p12 = por %p868_p0, %p867_p8 }
 0x23d   : > { %p870_p13 = pnand %p869_p12, %p863_p2 }
 0x23f   : > { %873 = shalt.err (!%p870_p13)
}
 0x240   : > { %s940_s4 = smov 256   ;;  %s941_s18 = smov 16  }
 0x241   : > { %702 = dma.vmem_to_hbm [thread:$0]  (%p1279_p3), %s1211_s17, 512, %s1209_s10, %s539_s23, %s940_s4, %s940_s4, %s941_s18  }
 0x242 PF: > { %s569_s13 = sand.u32 1, %s912_s20   ;;  %p1280_p7 = scmp.ne.s32.totalorder %s1273_s9, 0 }
 0x243   : > { %p1281_p10 = scmp.ge.s32.totalorder %s932_s25, 2  ;;  %s570_s30 = scalar_lea.sflag [#allocation5], %s569_s13 }
 0x245   : > { %p712_p9 = pnand %p1281_p10, %p1280_p7 }
 0x247   : > { %907 = dma.done.wait (!%p712_p9), %s570_s30, 512  }
 0x248   : > { %909 = vsyncadd (!%p712_p9), %s570_s30, 4294966784  ;;  %s25_s25 = sadd.s32 1, %s932_s25   ;;  %s1282_s20 = smov %s916_s21 }
 0x249   : > { %p22_p11 = scmp.ge.s32.totalorder %s25_s25, 4   ;;  %s1283_s21 = smov %s920_s22 }
 0x24a   : > { %s1284_s22 = smov %s1031_s8  ;;  %s1285_s23 = smov %s928_s24 }
 0x24b   : > { %s1286_s24 = smov %s1288_s27  ;;  %24 = sbr.rel (!%p22_p11) target bundleno = 10 (0xa), region = 98 }
 0x252   :  { %575 = vsyncpa [#allocation4], 1 }
 0x253   :  { %577 = vsyncpa [#allocation4 + $0x1], 1 }
 0x254   :  { %578 = vsyncpa [#allocation7], 1 }
 0x255   :  { %580 = vsyncpa [#allocation7 + $0x1], 1 }
 0x256   :  { %581 = vsyncpa [#allocation5], 1 }
 0x257   :  { %583 = vsyncpa [#allocation5 + $0x1], 1 }

</bundles_post_ra>
